<compile_context>
chip_gen: v7x
topology: tpu7x:2x2x1
jax: 0.10.0
libtpu: 0.0.40
codegen_flags: <defaults>
</compile_context>

<pallas_src>
import functools

import jax
import jax.numpy as jnp
from jax.experimental import pallas as pl
from jax.experimental.pallas import tpu as pltpu

D_IN = 784
D_HID = 64
D_OUT = 10
LANES = 128  # padded logits width (lane-dense output)


# ---------------------------------------------------------------------------
# Fused Pallas kernel: one batch row-tile of  sigmoid(x@W1 + b1) @ W2p + b2p
# ---------------------------------------------------------------------------
def _mlp_kernel(x_ref, w1_ref, b1_ref, w2_ref, b2_ref, o_ref):
    h = jnp.dot(x_ref[...], w1_ref[...], preferred_element_type=jnp.float32)
    h = jax.nn.sigmoid(h + b1_ref[...])               # (tm, 64), stays in vregs
    o = jnp.dot(h, w2_ref[...], preferred_element_type=jnp.float32) + b2_ref[...]
    o_ref[...] = o.astype(o_ref.dtype)


# ---------------------------------------------------------------------------
# Tiling policy
# ---------------------------------------------------------------------------
def _tensorcores_per_chip():
    """v7x exposes 2 TensorCores per chip behind one device; v5e/v6e have 1."""
    kind = str(getattr(jax.devices()[0], "device_kind", "")).lower()
    return 2 if "v7" in kind else 1


def _pick_tm(rows, num_cores):
    """Row-tile size.  Big tiles amortize the ~0.35 us per-grid-step overhead
    (auto-pipeline hits ~85% of HBM roofline at 512-1024 rows vs ~63% at 256).
    Single-TC chips (v5e/v6e): one grid step whenever the batch fits under the
    cap.  Multi-TC (v7x): an even number of >=2 steps so both cores get work.
    tm stays a multiple of 8 (sublane constraint); the grid over-covers."""
    cap = 1024
    rows8 = ((rows + 7) // 8) * 8
    if num_cores <= 1 or rows8 < 16:
        return min(rows8, cap)
    steps = max(2, -(-rows8 // cap))      # ceil-div, at least 2
    if steps % 2:
        steps += 1                        # even step count across 2 TCs
    tm = ((-(-rows8 // steps)) + 7) // 8 * 8
    return max(8, min(tm, cap))


# ---------------------------------------------------------------------------
# One-time parameter preprocessing (hoisted out of the per-call forward)
# ---------------------------------------------------------------------------
def preprocess_params(params):
    """params = (w1, b1, w10, b10) in torch layout:
    w1 (64, 784), b1 (64,), w10 (10, 64), b10 (10,)."""
    w1, b1, w2, b2 = params
    w1t = jnp.asarray(w1, jnp.float32).T                       # (784, 64)
    b1r = jnp.asarray(b1, jnp.float32).reshape(1, D_HID)       # (1, 64)
    # Lane-dense final layer: zero-pad 10 output columns up to 128 lanes.
    w2p = jnp.zeros((D_HID, LANES), jnp.float32).at[:, :D_OUT].set(
        jnp.asarray(w2, jnp.float32).T)                        # (64, 128)
    b2p = jnp.zeros((1, LANES), jnp.float32).at[:, :D_OUT].set(
        jnp.asarray(b2, jnp.float32))                          # (1, 128)
    return w1t, b1r, w2p, b2p


# ---------------------------------------------------------------------------
# Forward (jit-friendly: shapes are static, tiling picked at trace time)
# ---------------------------------------------------------------------------
def mlp1_sigmoid_forward(x, prep_params):
    w1t, b1r, w2p, b2p = prep_params
    xf = x.reshape(-1, D_IN)                          # == torch x.view(-1, 784)
    B = xf.shape[0]
    tm = _pick_tm(B, _tensorcores_per_chip())
    grid = (pl.cdiv(B, tm),)                          # over-cover; no jnp.pad copy

    out = pl.pallas_call(
        _mlp_kernel,
        out_shape=jax.ShapeDtypeStruct((B, LANES), jnp.float32),
        grid=grid,
        in_specs=[
            pl.BlockSpec((tm, D_IN), lambda i: (i, 0)),      # batch row tile
            pl.BlockSpec((D_IN, D_HID), lambda i: (0, 0)),   # fc1 weight (resident)
            pl.BlockSpec((1, D_HID), lambda i: (0, 0)),      # fc1 bias
            pl.BlockSpec((D_HID, LANES), lambda i: (0, 0)),  # fc10 weight, padded
            pl.BlockSpec((1, LANES), lambda i: (0, 0)),      # fc10 bias, padded
        ],
        out_specs=pl.BlockSpec((tm, LANES), lambda i: (i, 0)),
        compiler_params=pltpu.CompilerParams(
            dimension_semantics=("parallel",),
            vmem_limit_bytes=32 * 1024 * 1024,
        ),
    )(xf, w1t, b1r, w2p, b2p)
    # Slice BEFORE any downstream reduction/finiteness check: padded lanes
    # beyond 10 are zeros; rows beyond B never exist in out_shape.
    return out[:, :D_OUT]


# ---------------------------------------------------------------------------
# Pure-JAX reference for a sanity check
# ---------------------------------------------------------------------------
def reference_forward(x, params):
    w1, b1, w2, b2 = params
    xf = x.reshape(-1, D_IN)
    h = jax.nn.sigmoid(xf @ w1.T + b1)
    return h @ w2.T + b2


# ---------------------------------------------------------------------------
# main
# ---------------------------------------------------------------------------
if __name__ == "__main__":
    key = jax.random.PRNGKey(0)
    ks = jax.random.split(key, 5)

    def uinit(k, shape, fan_in):
        bound = 1.0 / jnp.sqrt(jnp.float32(fan_in))
        return jax.random.uniform(k, shape, jnp.float32, -bound, bound)

    # torch.nn.Linear default init layout
    w1 = uinit(ks[0], (D_HID, D_IN), D_IN)     # fc1.weight  (64, 784)
    b1 = uinit(ks[1], (D_HID,), D_IN)          # fc1.bias    (64,)
    w10 = uinit(ks[2], (D_OUT, D_HID), D_HID)  # fc10.weight (10, 64)
    b10 = uinit(ks[3], (D_OUT,), D_HID)        # fc10.bias   (10,)
    params = (w1, b1, w10, b10)

    # One-time preprocessing (hoisted out of the per-call forward).
    prep = jax.tree_util.tree_map(jax.block_until_ready, preprocess_params(params))

    # Small MNIST-like batch; forward does x.view(-1, 784).
    x = jax.random.normal(ks[4], (16, 1, 28, 28), jnp.float32)

    fwd = jax.jit(mlp1_sigmoid_forward)
    out = jax.block_until_ready(fwd(x, prep))
    assert out.shape == (16, D_OUT), out.shape
    assert bool(jnp.all(jnp.isfinite(out)))

    ref = jax.block_until_ready(jax.jit(reference_forward)(x, params))
    assert bool(jnp.allclose(out, ref, rtol=1e-5, atol=1e-5)), (
        float(jnp.max(jnp.abs(out - ref))))

    print("KERNEL_OK")
</pallas_src>

<mosaic_0001>
module attributes {stable_mosaic.version = 11 : i64} {
  func.func @_mlp_kernel(%arg0: i32, %arg1: memref<16x784xf32, #tpu.memory_space<vmem>>, %arg2: memref<784x64xf32, #tpu.memory_space<vmem>>, %arg3: memref<1x64xf32, #tpu.memory_space<vmem>>, %arg4: memref<64x128xf32, #tpu.memory_space<vmem>>, %arg5: memref<1x128xf32, #tpu.memory_space<vmem>>, %arg6: memref<16x128xf32, #tpu.memory_space<vmem>>) attributes {dimension_semantics = [#tpu.dimension_semantics<parallel>], iteration_bounds = array<i64: 1>, scalar_prefetch = 0 : i64, scratch_operands = 0 : i64, tpu.core_type = #tpu.core_type<tc>, window_params = [{transform_indices = @transform_0, window_bounds = array<i64: 16, 784>}, {pipeline_mode = #tpu.pipeline_mode<synchronous>, transform_indices = @transform_1, window_bounds = array<i64: 784, 64>}, {pipeline_mode = #tpu.pipeline_mode<synchronous>, transform_indices = @transform_2, window_bounds = array<i64: 1, 64>}, {pipeline_mode = #tpu.pipeline_mode<synchronous>, transform_indices = @transform_3, window_bounds = array<i64: 64, 128>}, {pipeline_mode = #tpu.pipeline_mode<synchronous>, transform_indices = @transform_4, window_bounds = array<i64: 1, 128>}, {transform_indices = @transform_5, window_bounds = array<i64: 16, 128>}]} {
    %c0 = arith.constant 0 : index
    %c0_0 = arith.constant 0 : index
    %0 = vector.load %arg1[%c0, %c0_0] : memref<16x784xf32, #tpu.memory_space<vmem>>, vector<16x784xf32>
    %c0_1 = arith.constant 0 : index
    %c0_2 = arith.constant 0 : index
    %1 = vector.load %arg2[%c0_1, %c0_2] : memref<784x64xf32, #tpu.memory_space<vmem>>, vector<784x64xf32>
    %cst = arith.constant dense<0.000000e+00> : vector<16x64xf32>
    %2 = tpu.matmul %0, %1, %cst {dimension_numbers = #tpu.dot_dimension_numbers<[1], [0], [0], [1], [0, 0, 1, 1], [], []>} : vector<16x784xf32>, vector<784x64xf32>, vector<16x64xf32> -> vector<16x64xf32>
    %c0_3 = arith.constant 0 : index
    %c0_4 = arith.constant 0 : index
    %3 = vector.load %arg3[%c0_3, %c0_4] : memref<1x64xf32, #tpu.memory_space<vmem>>, vector<1x64xf32>
    %4 = vector.broadcast %3 : vector<1x64xf32> to vector<16x64xf32>
    %5 = arith.addf %2, %4 : vector<16x64xf32>
    %6 = arith.negf %5 : vector<16x64xf32>
    %7 = math.exp %6 : vector<16x64xf32>
    %cst_5 = arith.constant 1.000000e+00 : f32
    %8 = vector.broadcast %cst_5 : f32 to vector<16x64xf32>
    %9 = arith.addf %8, %7 : vector<16x64xf32>
    %10 = arith.divf %8, %9 : vector<16x64xf32>
    %c0_6 = arith.constant 0 : index
    %c0_7 = arith.constant 0 : index
    %11 = vector.load %arg4[%c0_6, %c0_7] : memref<64x128xf32, #tpu.memory_space<vmem>>, vector<64x128xf32>
    %cst_8 = arith.constant dense<0.000000e+00> : vector<16x128xf32>
    %12 = tpu.matmul %10, %11, %cst_8 {dimension_numbers = #tpu.dot_dimension_numbers<[1], [0], [0], [1], [0, 0, 1, 1], [], []>} : vector<16x64xf32>, vector<64x128xf32>, vector<16x128xf32> -> vector<16x128xf32>
    %c0_9 = arith.constant 0 : index
    %c0_10 = arith.constant 0 : index
    %13 = vector.load %arg5[%c0_9, %c0_10] : memref<1x128xf32, #tpu.memory_space<vmem>>, vector<1x128xf32>
    %14 = vector.broadcast %13 : vector<1x128xf32> to vector<16x128xf32>
    %15 = arith.addf %12, %14 : vector<16x128xf32>
    %c0_11 = arith.constant 0 : index
    %c0_12 = arith.constant 0 : index
    %16 = vector.load %arg6[%c0_11, %c0_12] : memref<16x128xf32, #tpu.memory_space<vmem>>, vector<16x128xf32>
    tpu.vector_store %arg6[%c0_11, %c0_12], %15 {strides = array<i32>} : memref<16x128xf32, #tpu.memory_space<vmem>>, vector<16x128xf32>,
    return
  }
  func.func @transform_0(%arg0: i32) -> (i32, i32) {
    %c0_i32 = arith.constant 0 : i32
    %c0_i32_0 = arith.constant 0 : i32
    return %arg0, %c0_i32 : i32, i32
  }
  func.func @transform_1(%arg0: i32) -> (i32, i32) {
    %c0_i32 = arith.constant 0 : i32
    %c0_i32_0 = arith.constant 0 : i32
    %c0_i32_1 = arith.constant 0 : i32
    return %c0_i32, %c0_i32_0 : i32, i32
  }
  func.func @transform_2(%arg0: i32) -> (i32, i32) {
    %c0_i32 = arith.constant 0 : i32
    %c0_i32_0 = arith.constant 0 : i32
    %c0_i32_1 = arith.constant 0 : i32
    return %c0_i32, %c0_i32_0 : i32, i32
  }
  func.func @transform_3(%arg0: i32) -> (i32, i32) {
    %c0_i32 = arith.constant 0 : i32
    %c0_i32_0 = arith.constant 0 : i32
    %c0_i32_1 = arith.constant 0 : i32
    return %c0_i32, %c0_i32_0 : i32, i32
  }
  func.func @transform_4(%arg0: i32) -> (i32, i32) {
    %c0_i32 = arith.constant 0 : i32
    %c0_i32_0 = arith.constant 0 : i32
    %c0_i32_1 = arith.constant 0 : i32
    return %c0_i32, %c0_i32_0 : i32, i32
  }
  func.func @transform_5(%arg0: i32) -> (i32, i32) {
    %c0_i32 = arith.constant 0 : i32
    %c0_i32_0 = arith.constant 0 : i32
    return %arg0, %c0_i32 : i32, i32
  }
}

</mosaic_0001>

<bundles_post_ra>
// kernel: mlp1_sigmoid_forward.1
= control target key start
LH: loop header
LB: loop body
LE: loop exit
PB: predicated region body
PF: predicated region fallthrough
CT: control target
= control target key end

     0   :  { %s1298_s0 = inlined_call_operand.vmem [shape: f32[16,784], index: 0, kind: input, shape index: {}]   ;;  %s1299_s1 = inlined_call_operand.vmem [shape: f32[784,64], index: 1, kind: input, shape index: {}]   ;;  %s1300_s2 = inlined_call_operand.vmem [shape: f32[1,64], index: 2, kind: input, shape index: {}]   ;;  %s1301_s3 = inlined_call_operand.vmem [shape: f32[64,128], index: 3, kind: input, shape index: {}]   ;;  %s1302_s4 = inlined_call_operand.vmem [shape: f32[1,128], index: 4, kind: input, shape index: {}]   ;;  %s1303_s5 = inlined_call_operand.hbm [shape: f32[16,128], index: 5, kind: output, shape index: {}]  }
   0x1   :  { %v51_v0 = vld [vmem:[%s1299_s1 + $0x80] sm:$0xff]  ;;  %v52_v1 = vld [vmem:[%s1299_s1 + $0x88] sm:$0xff]  ;;  %v53_v11 = vld [vmem:[%s1299_s1 + $0x90] sm:$0xff] }
   0x2   :  { %v35_v2 = vld [vmem:[%s1299_s1] sm:$0xff]  ;;  %v736_v3 = vpack.c.bf16 %v52_v1, %v51_v0  ;;  %v36_v4 = vld [vmem:[%s1299_s1 + $0x8] sm:$0xff]  ;;  %v54_v13 = vld [vmem:[%s1299_s1 + $0x98] sm:$0xff] }
   0x3   :  { %v83_v5 = vld [vmem:[%s1299_s1 + $0x180] sm:$0xff]  ;;  %v84_v6 = vld [vmem:[%s1299_s1 + $0x188] sm:$0xff]  ;;  %v738_v7 = vpack.c.bf16 %v36_v4, %v35_v2  ;;  %v37_v14 = vld [vmem:[%s1299_s1 + $0x10] sm:$0xff]  ;;  %v740_v16 = vpack.c.bf16 %v54_v13, %v53_v11 }
   0x4   :  { %v768_v8 = vpack.c.bf16 %v84_v6, %v83_v5  ;;  %v67_v9 = vld [vmem:[%s1299_s1 + $0x100] sm:$0xff]  ;;  %v68_v10 = vld [vmem:[%s1299_s1 + $0x108] sm:$0xff]  ;;  %737 = vmatprep.subr.bf16.mxu0 %v736_v3  ;;  %v38_v15 = vld [vmem:[%s1299_s1 + $0x18] sm:$0xff] }
   0x5   :  { %v770_v12 = vpack.c.bf16 %v68_v10, %v67_v9  ;;  %739 = vmatpush3.bf16.msra.mxu0 %v738_v7  ;;  %v742_v17 = vpack.c.bf16 %v38_v15, %v37_v14  ;;  %v85_v18 = vld [vmem:[%s1299_s1 + $0x190] sm:$0xff]  ;;  %v86_v19 = vld [vmem:[%s1299_s1 + $0x198] sm:$0xff]  ;;  %v55_v23 = vld [vmem:[%s1299_s1 + $0xa0] sm:$0xff] }
   0x6   :  { %769 = vmatprep.subr.bf16.mxu1 %v768_v8  ;;  %v69_v20 = vld [vmem:[%s1299_s1 + $0x110] sm:$0xff]  ;;  %v772_v21 = vpack.c.bf16 %v86_v19, %v85_v18  ;;  %v70_v22 = vld [vmem:[%s1299_s1 + $0x118] sm:$0xff]  ;;  %v56_v24 = vld [vmem:[%s1299_s1 + $0xa8] sm:$0xff]  ;;  %741 = vmatprep.subr.bf16.mxu0 %v740_v16 }
   0x7   :  { %771 = vmatpush3.bf16.msra.mxu1 %v770_v12  ;;  %v774_v25 = vpack.c.bf16 %v70_v22, %v69_v20  ;;  %v744_v26 = vpack.c.bf16 %v56_v24, %v55_v23  ;;  %v39_v27 = vld [vmem:[%s1299_s1 + $0x20] sm:$0xff]  ;;  %v40_v28 = vld [vmem:[%s1299_s1 + $0x28] sm:$0xff]  ;;  %v57_v35 = vld [vmem:[%s1299_s1 + $0xb0] sm:$0xff] }
   0x8   :  { %v87_v29 = vld [vmem:[%s1299_s1 + $0x1a0] sm:$0xff]  ;;  %773 = vmatprep.subr.bf16.mxu1 %v772_v21  ;;  %v88_v30 = vld [vmem:[%s1299_s1 + $0x1a8] sm:$0xff]  ;;  %v746_v33 = vpack.c.bf16 %v40_v28, %v39_v27  ;;  %v58_v36 = vld [vmem:[%s1299_s1 + $0xb8] sm:$0xff] }
   0x9   :  { %v71_v31 = vld [vmem:[%s1299_s1 + $0x120] sm:$0xff]  ;;  %v72_v32 = vld [vmem:[%s1299_s1 + $0x128] sm:$0xff]  ;;  %743 = vmatpush3.bf16.msra.mxu0 %v742_v17  ;;  %v776_v34 = vpack.c.bf16 %v88_v30, %v87_v29  ;;  %v41_v37 = vld [vmem:[%s1299_s1 + $0x30] sm:$0xff]  ;;  %v748_v39 = vpack.c.bf16 %v58_v36, %v57_v35 }
   0xa   :  { %745 = vmatprep.subr.bf16.mxu0 %v744_v26  ;;  %v778_v38 = vpack.c.bf16 %v72_v32, %v71_v31  ;;  %v42_v40 = vld [vmem:[%s1299_s1 + $0x38] sm:$0xff]  ;;  %v89_v41 = vld [vmem:[%s1299_s1 + $0x1b0] sm:$0xff]  ;;  %v59_v46 = vld [vmem:[%s1299_s1 + $0xc0] sm:$0xff] }
   0xb   :  { %775 = vmatpush3.bf16.msra.mxu1 %v774_v25  ;;  %v90_v42 = vld [vmem:[%s1299_s1 + $0x1b8] sm:$0xff]  ;;  %v73_v44 = vld [vmem:[%s1299_s1 + $0x130] sm:$0xff]  ;;  %v60_v47 = vld [vmem:[%s1299_s1 + $0xc8] sm:$0xff]  ;;  %v750_v48 = vpack.c.bf16 %v42_v40, %v41_v37 }
   0xc   :  { %777 = vmatprep.subr.bf16.mxu1 %v776_v34  ;;  %v780_v43 = vpack.c.bf16 %v90_v42, %v89_v41  ;;  %v74_v45 = vld [vmem:[%s1299_s1 + $0x138] sm:$0xff]  ;;  %v91_v49 = vld [vmem:[%s1299_s1 + $0x1c0] sm:$0xff]  ;;  %v92_v50 = vld [vmem:[%s1299_s1 + $0x1c8] sm:$0xff]  ;;  %v752_v52 = vpack.c.bf16 %v60_v47, %v59_v46 }
   0xd   :  { %747 = vmatpush3.bf16.msra.mxu0 %v746_v33  ;;  %v782_v51 = vpack.c.bf16 %v74_v45, %v73_v44  ;;  %v43_v53 = vld [vmem:[%s1299_s1 + $0x40] sm:$0xff]  ;;  %v44_v54 = vld [vmem:[%s1299_s1 + $0x48] sm:$0xff]  ;;  %v784_v56 = vpack.c.bf16 %v92_v50, %v91_v49  ;;  %v61_v58 = vld [vmem:[%s1299_s1 + $0xd0] sm:$0xff] }
   0xe   :  { %749 = vmatprep.subr.bf16.mxu0 %v748_v39  ;;  %v75_v55 = vld [vmem:[%s1299_s1 + $0x140] sm:$0xff]  ;;  %v76_v57 = vld [vmem:[%s1299_s1 + $0x148] sm:$0xff]  ;;  %v62_v59 = vld [vmem:[%s1299_s1 + $0xd8] sm:$0xff]  ;;  %v754_v62 = vpack.c.bf16 %v44_v54, %v43_v53 }
   0xf   :  { %779 = vmatpush3.bf16.msra.mxu1 %v778_v38  ;;  %v93_v60 = vld [vmem:[%s1299_s1 + $0x1d0] sm:$0xff]  ;;  %v94_v61 = vld [vmem:[%s1299_s1 + $0x1d8] sm:$0xff]  ;;  %v786_v63 = vpack.c.bf16 %v76_v57, %v75_v55  ;;  %v756_v0 = vpack.c.bf16 %v62_v59, %v61_v58  ;;  %v63_v6 = vld [vmem:[%s1299_s1 + $0xe0] sm:$0xff] }
  0x10   :  { %781 = vmatprep.subr.bf16.mxu1 %v780_v43  ;;  %v45_v1 = vld [vmem:[%s1299_s1 + $0x50] sm:$0xff]  ;;  %v46_v2 = vld [vmem:[%s1299_s1 + $0x58] sm:$0xff]  ;;  %v788_v4 = vpack.c.bf16 %v94_v61, %v93_v60  ;;  %v64_v7 = vld [vmem:[%s1299_s1 + $0xe8] sm:$0xff] }
  0x11   :  { %751 = vmatpush3.bf16.msra.mxu0 %v750_v48  ;;  %v77_v3 = vld [vmem:[%s1299_s1 + $0x150] sm:$0xff]  ;;  %v78_v5 = vld [vmem:[%s1299_s1 + $0x158] sm:$0xff]  ;;  %v95_v8 = vld [vmem:[%s1299_s1 + $0x1e0] sm:$0xff]  ;;  %v758_v10 = vpack.c.bf16 %v46_v2, %v45_v1  ;;  %v760_v14 = vpack.c.bf16 %v64_v7, %v63_v6 }
  0x12   :  { %753 = vmatprep.subr.bf16.mxu0 %v752_v52  ;;  %v96_v9 = vld [vmem:[%s1299_s1 + $0x1e8] sm:$0xff]  ;;  %v47_v11 = vld [vmem:[%s1299_s1 + $0x60] sm:$0xff]  ;;  %v790_v13 = vpack.c.bf16 %v78_v5, %v77_v3  ;;  %v65_v19 = vld [vmem:[%s1299_s1 + $0xf0] sm:$0xff] }
  0x13   :  { %783 = vmatpush3.bf16.msra.mxu1 %v782_v51  ;;  %v22_v12 = vld [vmem:[%s1298_s0 + $0x8] sm:$0xff]  ;;  %v79_v16 = vld [vmem:[%s1299_s1 + $0x160] sm:$0xff]  ;;  %v792_v18 = vpack.c.bf16 %v96_v9, %v95_v8  ;;  %v66_v20 = vld [vmem:[%s1299_s1 + $0xf8] sm:$0xff] }
  0x14   :  { %785 = vmatprep.subr.bf16.mxu1 %v784_v56  ;;  %v48_v15 = vld [vmem:[%s1299_s1 + $0x68] sm:$0xff]  ;;  %211 = vmatprep.mubr.f32.mxu0 %v22_v12  ;;  %v24_v21 = vld [vmem:[%s1298_s0 + $0x18] sm:$0xff]  ;;  %v97_v22 = vld [vmem:[%s1299_s1 + $0x1f0] sm:$0xff]  ;;  %v764_v26 = vpack.c.bf16 %v66_v20, %v65_v19 }
  0x15   :  { %755 = vmatpush3.bf16.msra.mxu0 %v754_v62  ;;  %v80_v17 = vld [vmem:[%s1299_s1 + $0x168] sm:$0xff]  ;;  %v98_v23 = vld [vmem:[%s1299_s1 + $0x1f8] sm:$0xff]  ;;  %286 = vmatprep.mubr.f32.mxu1 %v24_v21  ;;  %v762_v24 = vpack.c.bf16 %v48_v15, %v47_v11  ;;  %v49_v27 = vld [vmem:[%s1299_s1 + $0x70] sm:$0xff] }
  0x16   :  { %757 = vmatprep.subr.bf16.mxu0 %v756_v0  ;;  %v794_v25 = vpack.c.bf16 %v80_v17, %v79_v16  ;;  %v50_v28 = vld [vmem:[%s1299_s1 + $0x78] sm:$0xff]  ;;  %v81_v29 = vld [vmem:[%s1299_s1 + $0x170] sm:$0xff]  ;;  %v796_v30 = vpack.c.bf16 %v98_v23, %v97_v22  ;;  %v115_v32 = vld [vmem:[%s1299_s1 + $0x280] sm:$0xff] }
  0x17   :  { %787 = vmatpush3.bf16.msra.mxu1 %v786_v63  ;;  %v82_v31 = vld [vmem:[%s1299_s1 + $0x178] sm:$0xff]  ;;  %v116_v33 = vld [vmem:[%s1299_s1 + $0x288] sm:$0xff]  ;;  %v766_v34 = vpack.c.bf16 %v50_v28, %v49_v27  ;;  %v99_v37 = vld [vmem:[%s1299_s1 + $0x200] sm:$0xff] }
  0x18   :  { %789 = vmatprep.subr.bf16.mxu1 %v788_v4  ;;  %v798_v35 = vpack.c.bf16 %v82_v31, %v81_v29  ;;  %v800_v36 = vpack.c.bf16 %v116_v33, %v115_v32  ;;  %v100_v38 = vld [vmem:[%s1299_s1 + $0x208] sm:$0xff]  ;;  %v117_v39 = vld [vmem:[%s1299_s1 + $0x290] sm:$0xff]  ;;  %v118_v40 = vld [vmem:[%s1299_s1 + $0x298] sm:$0xff] }
  0x19   :  { %759 = vmatpush3.bf16.msra.mxu0 %v758_v10  ;;  %v21_v41 = vld [vmem:[%s1298_s0] sm:$0xff]  ;;  %v802_v42 = vpack.c.bf16 %v100_v38, %v99_v37  ;;  %v23_v43 = vld [vmem:[%s1298_s0 + $0x10] sm:$0xff]  ;;  %v804_v44 = vpack.c.bf16 %v118_v40, %v117_v39  ;;  %v102_v46 = vld [vmem:[%s1299_s1 + $0x218] sm:$0xff] }
  0x1a   :  { %761 = vmatprep.subr.bf16.mxu0 %v760_v14  ;;  %v101_v45 = vld [vmem:[%s1299_s1 + $0x210] sm:$0xff]  ;;  %v119_v47 = vld [vmem:[%s1299_s1 + $0x2a0] sm:$0xff]  ;;  %v120_v48 = vld [vmem:[%s1299_s1 + $0x2a8] sm:$0xff] }
  0x1b   :  { %791 = vmatpush3.bf16.msra.mxu1 %v790_v13  ;;  %v29_v49 = vld [vmem:[%s1298_s0 + $0x40] sm:$0xff]  ;;  %v31_v51 = vld [vmem:[%s1298_s0 + $0x50] sm:$0xff]  ;;  %v132_v52 = vld [vmem:[%s1299_s1 + $0x308] sm:$0xff]  ;;  %v806_v53 = vpack.c.bf16 %v102_v46, %v101_v45  ;;  %v808_v57 = vpack.c.bf16 %v120_v48, %v119_v47 }
  0x1c   :  { %793 = vmatprep.subr.bf16.mxu1 %v792_v18  ;;  %v131_v50 = vld [vmem:[%s1299_s1 + $0x300] sm:$0xff]  ;;  %v28_v55 = vld [vmem:[%s1298_s0 + $0x38] sm:$0xff]  ;;  %v104_v58 = vld [vmem:[%s1299_s1 + $0x228] sm:$0xff] }
  0x1d   :  { %763 = vmatpush3.bf16.msra.mxu0 %v762_v24  ;;  %v103_v54 = vld [vmem:[%s1299_s1 + $0x220] sm:$0xff]  ;;  %v832_v56 = vpack.c.bf16 %v132_v52, %v131_v50  ;;  %v30_v59 = vld [vmem:[%s1298_s0 + $0x48] sm:$0xff] }
  0x1e   :  { %765 = vmatprep.subr.bf16.mxu0 %v764_v26 }
  0x1f   :  { %795 = vmatpush3.bf16.msra.mxu1 %v794_v25 }
  0x20   :  { %797 = vmatprep.subr.bf16.mxu1 %v796_v30 }
  0x21   :  { %767 = vmatpush3.bf16.msra.mxu0 %v766_v34 }
  0x22   :  { %801 = vmatprep.subr.bf16.mxu0 %v800_v36 }
  0x23   :  { %799 = vmatpush3.bf16.msra.mxu1 %v798_v35 }
  0x24   :  { %212 = vmatmul.mubr.f32.vlgmr.msra.gmra.mrb[0].mxu0 %v21_v41 }
  0x25   :  { %803 = vmatpush3.bf16.msra.mxu0 %v802_v42  ;;  %216 = vmatprep.mubr.f32.mxu0 %v29_v49 }
  0x26   :  { %287 = vmatmul.mubr.f32.vlgmr.msra.gmra.mrb[0].mxu1 %v23_v43  ;;  %805 = vmatprep.subr.bf16.mxu0 %v804_v44 }
  0x27   :  { %10 = vsyncpa [#allocation3], 0  ;;  %v121_v60 = vld [vmem:[%s1299_s1 + $0x2b0] sm:$0xff]  ;;  %v122_v61 = vld [vmem:[%s1299_s1 + $0x2b8] sm:$0xff]  ;;  %291 = vmatprep.mubr.f32.mxu1 %v31_v51  ;;  %833 = vmatprep.subr.bf16.mxu1 %v832_v56  ;;  %vm140_vm0 = vcmask 130048   ;;  %v810_v0 = vpack.c.bf16 %v104_v58, %v103_v54  ;;  %vm474_vm1 = vcmask 523264  }
  0x28   :  { %v26_v62 = vld [vmem:[%s1298_s0 + $0x28] sm:$0xff]  ;;  %217 = vmatmul.mubr.f32.gmra.mrb[2].mxu0 %v28_v55  ;;  %835 = vmatpush3.bf16.msra.mxu1 %v832_v56  ;;  %v27_v63 = vld [vmem:[%s1298_s0 + $0x30] sm:$0xff]  ;;  %v812_v1 = vpack.c.bf16 %v122_v61, %v121_v60  ;;  %v106_v3 = vld [vmem:[%s1299_s1 + $0x238] sm:$0xff]  ;;  %s887_s8 = smov [#allocation2]  }
  0x29   :  { %807 = vmatpush3.bf16.msra.mxu0 %v806_v53  ;;  %v105_v2 = vld [vmem:[%s1299_s1 + $0x230] sm:$0xff]  ;;  %361 = vmatprep.mubr.f32.mxu0 %v26_v62  ;;  %v34_v4 = vld [vmem:[%s1298_s0 + $0x68] sm:$0xff]  ;;  %v123_v5 = vld [vmem:[%s1299_s1 + $0x2c0] sm:$0xff]  ;;  %s563_s9 = sshll.u32 %s887_s8, 4  ;;  %s564_s9 = int_to_ptr.vmem [resolvable:$true] %s563_s9 }
  0x2a   :  { %292 = vmatmul.mubr.f32.gmra.mrb[2].mxu1 %v30_v59  ;;  %809 = vmatprep.subr.bf16.mxu0 %v808_v57  ;;  %v124_v6 = vld [vmem:[%s1299_s1 + $0x2c8] sm:$0xff]  ;;  %v814_v7 = vpack.c.bf16 %v106_v3, %v105_v2  ;;  %v107_v9 = vld [vmem:[%s1299_s1 + $0x240] sm:$0xff]  ;;  %v125_v11 = vld [vmem:[%s1299_s1 + $0x2d0] sm:$0xff]  ;;  %s863_s10 = scalar_lea.vmem %s564_s9, 256  ;;  %p868_p1 = scmp.lt.s32.totalorder %s564_s9, %s564_s9 }
  0x2b   :  { %714 = vmatprep.mubr.msk.f32.mxu1 %vm140_vm0, %v27_v63  ;;  %v816_v8 = vpack.c.bf16 %v124_v6, %v123_v5  ;;  %v108_v10 = vld [vmem:[%s1299_s1 + $0x248] sm:$0xff]  ;;  %v126_v12 = vld [vmem:[%s1299_s1 + $0x2d8] sm:$0xff]  ;;  %v109_v15 = vld [vmem:[%s1299_s1 + $0x250] sm:$0xff]  ;;  %p864_p0 = scmp.ne.s32.totalorder %s564_s9, %s863_s10  ;;  %p869_p2 = scmp.lt.s32.totalorder %s863_s10, %s863_s10 }
  0x2c   :  { %v818_v13 = vpack.c.bf16 %v108_v10, %v107_v9  ;;  %v820_v14 = vpack.c.bf16 %v126_v12, %v125_v11  ;;  %v110_v16 = vld [vmem:[%s1299_s1 + $0x258] sm:$0xff]  ;;  %v127_v17 = vld [vmem:[%s1299_s1 + $0x2e0] sm:$0xff]  ;;  %v128_v18 = vld [vmem:[%s1299_s1 + $0x2e8] sm:$0xff] }
  0x2d   :  { %811 = vmatpush3.bf16.msra.mxu0 %v810_v0  ;;  %v822_v19 = vpack.c.bf16 %v110_v16, %v109_v15  ;;  %v824_v20 = vpack.c.bf16 %v128_v18, %v127_v17  ;;  %v111_v21 = vld [vmem:[%s1299_s1 + $0x260] sm:$0xff]  ;;  %v112_v22 = vld [vmem:[%s1299_s1 + $0x268] sm:$0xff]  ;;  %v129_v23 = vld [vmem:[%s1299_s1 + $0x2f0] sm:$0xff]  ;;  %p870_p3 = por %p869_p2, %p868_p1 }
  0x2e   :  { %715 = vmatmul.mubr.msk.f32.vlgmr.msra.gmra.mrb[4].mxu1 %vm140_vm0, %v34_v4  ;;  %813 = vmatprep.subr.bf16.mxu0 %v812_v1  ;;  %v130_v24 = vld [vmem:[%s1299_s1 + $0x2f8] sm:$0xff]  ;;  %v826_v25 = vpack.c.bf16 %v112_v22, %v111_v21  ;;  %v113_v27 = vld [vmem:[%s1299_s1 + $0x270] sm:$0xff]  ;;  %v25_v30 = vld [vmem:[%s1298_s0 + $0x20] sm:$0xff] }
  0x2f   :  { %v828_v26 = vpack.c.bf16 %v130_v24, %v129_v23  ;;  %v114_v28 = vld [vmem:[%s1299_s1 + $0x278] sm:$0xff]  ;;  %v33_v31 = vld [vmem:[%s1298_s0 + $0x60] sm:$0xff]  ;;  %v460_v34 = vld [vmem:[%s1301_s3 + $0x8] sm:$0xff]  ;;  %p871_p4 = pnand %p870_p3, %p864_p0 }
  0x30   :  { %v830_v29 = vpack.c.bf16 %v114_v28, %v113_v27  ;;  %v32_v32 = vld [vmem:[%s1298_s0 + $0x58] sm:$0xff]  ;;  %v459_v33 = vld [vmem:[%s1301_s3] sm:$0xff]  ;;  %v461_v36 = vld [vmem:[%s1301_s3 + $0x10] sm:$0xff] }
  0x31   :  { %815 = vmatpush3.bf16.msra.mxu0 %v814_v7  ;;  %v836_v35 = vpack.c.bf16 %v460_v34, %v459_v33  ;;  %v462_v37 = vld [vmem:[%s1301_s3 + $0x18] sm:$0xff]  ;;  %v463_v39 = vld [vmem:[%s1301_s3 + $0x20] sm:$0xff]  ;;  %v464_v40 = vld [vmem:[%s1301_s3 + $0x28] sm:$0xff] }
  0x32   :  { %817 = vmatprep.subr.bf16.mxu0 %v816_v8  ;;  %v840_v38 = vpack.c.bf16 %v462_v37, %v461_v36  ;;  %v465_v41 = vld [vmem:[%s1301_s3 + $0x30] sm:$0xff]  ;;  %v844_v42 = vpack.c.bf16 %v464_v40, %v463_v39  ;;  %v466_v43 = vld [vmem:[%s1301_s3 + $0x38] sm:$0xff]  ;;  %v574_v46 = vld [vmem:[%s1300_s2] ss:$0 sm:$0xff] }
  0x33   :  { %837 = vmatprep.subr.bf16.mxu1 %v836_v35  ;;  %v848_v44 = vpack.c.bf16 %v466_v43, %v465_v41  ;;  %v579_v18 = vld [vmem:[%s1302_s4] ss:$0 sm:$0xff] }
  0x34   :  { %839 = vmatpush3.bf16.msra.mxu1 %v836_v35 }
  0x35   :  { %819 = vmatpush3.bf16.msra.mxu0 %v818_v13  ;;  %841 = vmatprep.subr.bf16.mxu1 %v840_v38 }
  0x36   :  { %821 = vmatprep.subr.bf16.mxu0 %v820_v14 }
  0x38   :  { %843 = vmatpush3.bf16.msra.mxu1 %v840_v38 }
  0x39   :  { %823 = vmatpush3.bf16.msra.mxu0 %v822_v19  ;;  %845 = vmatprep.subr.bf16.mxu1 %v844_v42 }
  0x3a   :  { %825 = vmatprep.subr.bf16.mxu0 %v824_v20 }
  0x3c   :  { %847 = vmatpush3.bf16.msra.mxu1 %v844_v42 }
  0x3d   :  { %827 = vmatpush3.bf16.msra.mxu0 %v826_v25  ;;  %849 = vmatprep.subr.bf16.mxu1 %v848_v44 }
  0x3e   :  { %829 = vmatprep.subr.bf16.mxu0 %v828_v26 }
  0x40   :  { %851 = vmatpush3.bf16.msra.mxu1 %v848_v44 }
  0x41   :  { %831 = vmatpush3.bf16.msra.mxu0 %v830_v29 }
  0x44   :  { %362 = vmatmul.mubr.f32.vlgmr.msra.gmra.mrb[4].mxu0 %v25_v30 }
  0x45   :  { %366 = vmatprep.mubr.f32.mxu0 %v33_v31 }
  0x48   :  { %367 = vmatmul.mubr.f32.gmra.mrb[6].mxu0 %v32_v32 }
  0xf7   :  { %v614_v45 = vpop.f32.mrb[0].mxu0 }
  0xf8   :  { %v615_v47 = vpop.f32.mrb[1].mxu0 }
  0xf9   :  { %v652_v48 = vpop.f32.mrb[0].mxu1  ;;  %v616_v49 = vadd.f32 %v615_v47, %v614_v45 }
  0xfa   :  { %v653_v50 = vpop.f32.mrb[1].mxu1 }
  0xfb   :  { %v654_v51 = vadd.f32 %v653_v50, %v652_v48  ;;  %v214_v52 = vadd.f32 %v616_v49, %v574_v46  ;;  %v617_v53 = vpop.f32.mrb[2].mxu0 }
  0xfc   :  { %v618_v54 = vpop.f32.mrb[3].mxu0 }
  0xfd   :  { %v655_v55 = vpop.f32.mrb[2].mxu1  ;;  %v289_v56 = vadd.f32 %v654_v51, %v214_v52  ;;  %v619_v57 = vadd.f32 %v618_v54, %v617_v53 }
  0xfe   :  { %v656_v58 = vpop.f32.mrb[3].mxu1 }
  0xff   :  { %v657_v59 = vadd.f32 %v656_v58, %v655_v55  ;;  %v219_v60 = vadd.f32 %v619_v57, %v574_v46 }
 0x101   :  { %v716_v61 = vpop.f32.mrb[4].mxu1  ;;  %v294_v62 = vadd.f32 %v657_v59, %v219_v60 }
 0x102   :  { %v438_v63 = vpop.f32.mrb[5].mxu1 }
 0x117   :  { %v690_v0 = vpop.f32.mrb[4].mxu0 }
 0x118   :  { %v691_v1 = vpop.f32.mrb[5].mxu0 }
 0x119   :  { %v692_v2 = vadd.f32 %v691_v1, %v690_v0 }
 0x11b   :  { %v693_v3 = vpop.f32.mrb[6].mxu0  ;;  %v364_v4 = vadd.f32 %v692_v2, %v289_v56 }
 0x11c   :  { %v694_v5 = vpop.f32.mrb[7].mxu0 }
 0x11d   :  { %v695_v6 = vadd.f32 %v694_v5, %v693_v3  ;;  %v439_v7 = vadd.f32 %v438_v63, %v364_v4 }
 0x11f   :  { %v369_v8 = vadd.f32 %v695_v6, %v294_v62  ;;  %v577_v9 = vmul.f32 -1.442695, %v439_v7 }
 0x121   :  { %v444_v10 = vadd.f32 %v716_v61, %v369_v8  ;;  %855 = vpow2.f32 %v577_v9 }
 0x123   :  { %v578_v11 = vmul.f32 -1.442695, %v444_v10 }
 0x125   :  { %857 = vpow2.f32 %v578_v11 }
 0x12b   :  { %v856_v12 = vpop.eup %855 }
 0x12c   :  { %v453_v13 = vadd.f32 1.0, %v856_v12 }
 0x12e   :  { %859 = vrcp.f32 %v453_v13 }
 0x12f   :  { %v858_v14 = vpop.eup %857 }
 0x130   :  { %v454_v15 = vadd.f32 1.0, %v858_v14 }
 0x132   :  { %861 = vrcp.f32 %v454_v15 }
 0x138   :  { %v860_v16 = vpop.eup %859 }
 0x139   :  { %733 = vmatprep.mubr.msk.f32.mxu1 %vm474_vm1, %v860_v16 }
 0x13c   :  { %v862_v17 = vpop.eup %861 }
 0x13d   :  { %734 = vmatmul.mubr.msk.f32.vlgmr.msra.gmra.mrb[6].mxu1 %vm474_vm1, %v862_v17 }
 0x210   :  { %v735_v19 = vpop.f32.mrb[6].mxu1 }
 0x211   :  { %v553_v20 = vadd.f32 %v735_v19, %v579_v18  ;;  %v547_v21 = vpop.f32.mrb[7].mxu1 }
 0x212   :  { %v548_v22 = vadd.f32 %v579_v18, %v547_v21 }
 0x213   :  { %557 = vst [vmem:[#allocation2 + $0x8] sm:$0xff] %v553_v20 }
 0x214   :  { %556 = vst [vmem:[#allocation2] sm:$0xff] %v548_v22 }
 0x215   :  { %874 = shalt.err (!%p871_p4)
}
 0x216   :  { %s875_s4 = scalar_lea.hbm %s1303_s5, 256 }
 0x217   :  { %p876_p5 = scmp.ne.s32.totalorder %s1303_s5, %s875_s4  ;;  %p879_p6 = scmp.lt.u32.totalorder %s875_s4, %s1303_s5 }
 0x219   :  { %p881_p7 = pnand %p879_p6, %p876_p5 }
 0x21b   :  { %884 = shalt.err (!%p881_p7)
}
 0x21c   :  { %s888_s1 = smov 128   ;;  %s889_s17 = smov 8  }
 0x21d   :  { %569 = dma.vmem_to_hbm [thread:$0]  %s564_s9, 256, %s1303_s5, [#allocation3], %s888_s1, %s888_s1, %s889_s17  }
 0x21e   :  { %885 = dma.done.wait [#allocation3], 256  }
 0x21f   :  { %886 = vsyncadd [#allocation3], 4294967040 }
 0x220   :  { %573 = vsyncpa [#allocation3], 1 }

</bundles_post_ra>
